<compile_context>
chip_gen: v7x
topology: tpu7x:2x2x1
jax: 0.10.0
libtpu: 0.0.40
codegen_flags: <defaults>
</compile_context>

<pallas_src>
from functools import partial
from math import sqrt

import jax
import jax.numpy as jnp
from jax import lax
from jax.experimental import pallas as pl
from jax.experimental.pallas import tpu as pltpu


def _combined_attention_kernel(k_ref, q_ref, v_ref, mask_ref, betas_ref,
                               wk_ref, wq_ref, bq_ref, we_ref,
                               ctx_ref, alpha_ref,
                               kp_s, qp_s,
                               *, b_blk, kl, t_pad, t_chunk, n_chunks, d):
    cdt = wk_ref.dtype                                            # compute dtype

    # ---- Batched projections: fold the batch block into the MXU M dim. ----
    # Inputs arrive in their original dtype; the cast to the compute dtype
    # rides idle VPU slots here instead of an extra HBM pass in the wrapper.
    k_all = k_ref[...].reshape(b_blk * kl, d).astype(cdt)         # [B*KL, d]
    q_all = q_ref[...].reshape(b_blk * t_pad, d).astype(cdt)      # [B*T,  d]
    kp_s[...] = jnp.dot(k_all, wk_ref[...],
                        preferred_element_type=jnp.float32)       # [B*KL, d] f32
    qp_f32 = jnp.dot(q_all, wq_ref[...],
                     preferred_element_type=jnp.float32) + bq_ref[...]
    qp_s[...] = qp_f32.astype(cdt)                                # [B*T, d]

    # Energy weights as a [1, 1, d] f32 row (multiply + d-reduce stay in f32).
    we_b = we_ref[...].reshape(1, 1, d)

    def batch_body(b, carry):
        kp_b = kp_s[pl.ds(pl.multiple_of(b * kl, kl), kl), :].astype(cdt)  # [KL, d]
        v_b = v_ref[b].astype(cdt)                                # [KL, d]
        mask_b = mask_ref[b]                                      # [1, KL] int
        beta_b = betas_ref[b]                                     # [1, KL] f32

        def chunk_body(c, carry2):
            ts = pl.multiple_of(c * t_chunk, t_chunk)
            q0 = pl.multiple_of(b * t_pad + ts, t_chunk)
            qp_c = qp_s[pl.ds(q0, t_chunk), :]                    # [tc, d]

            # Energy for this T-chunk; live block bounded at [tc, KL, d].
            e = jnp.tanh(qp_c[:, None, :] + kp_b[None, :, :])     # [tc, KL, d]
            s_c = jnp.sum(e.astype(jnp.float32) * we_b, axis=-1)  # [tc, KL] f32

            # Mask + softmax over KL fused with the beta renormalization
            # (the softmax denominator cancels -> one normalization total).
            s_c = jnp.where(mask_b != 0, s_c, -1e9)
            m = jnp.max(s_c, axis=-1, keepdims=True)              # [tc, 1]
            ex = jnp.exp(s_c - m)                                  # [tc, KL]
            mod = ex * beta_b                                      # [tc, KL]
            den = jnp.sum(mod, axis=-1, keepdims=True)             # [tc, 1]
            r = pl.reciprocal(den, approx=True)
            r = r * (2.0 - den * r)            # one Newton step -> ~f32 exact
            mod = mod * r

            # Context rows for this chunk straight off the MXU.
            ctx_c = jnp.dot(mod.astype(cdt), v_b,
                            preferred_element_type=jnp.float32)    # [tc, d]
            ctx_ref[b, pl.ds(ts, t_chunk), :] = ctx_c.astype(ctx_ref.dtype)
            alpha_ref[b, pl.ds(ts, t_chunk), :] = mod.astype(alpha_ref.dtype)
            return carry2

        return lax.fori_loop(0, n_chunks, chunk_body, carry, unroll=True)

    lax.fori_loop(0, b_blk, batch_body, 0, unroll=True)


def combined_attention(k, v, q, mask, betas, params, *,
                       compute_dtype=jnp.float32, kv_buffer_count=None):
    """k, v: [bs, K, L, d]; q: [bs, T, d]; mask: [bs, K, L, 1] int; betas: [bs, K].

    compute_dtype: f32 for exact parity / on v5e; bf16 on v6e/v7x.
    kv_buffer_count: optional pipeline depth for the k/v streams (e.g. 3 on
    v5e if profiling shows exposed DMA).
    """
    bs, K, L, d = k.shape
    T = q.shape[1]
    KL = K * L
    cdt = jnp.dtype(compute_dtype)

    # T padded to a multiple of the 8-row chunk; padded rows sliced off below.
    t_chunk = 8
    T_pad = ((T + t_chunk - 1) // t_chunk) * t_chunk
    n_chunks = T_pad // t_chunk

    # Layout-only glue (reshapes are free); NO dtype casts of the big operands
    # here -- the kernel casts after the DMA.
    k2 = k.reshape(bs, KL, d)
    v2 = v.reshape(bs, KL, d)
    q2 = q if T_pad == T else jnp.pad(q, ((0, 0), (0, T_pad - T), (0, 0)))
    mask_row = mask.reshape(bs, 1, KL)                                  # int
    betas_row = jnp.repeat(betas.astype(jnp.float32), L,
                           axis=1).reshape(bs, 1, KL)                   # tiny

    # nn.Linear does x @ W.T + b -> pre-transpose the (tiny) weights once.
    wkT = params["wk"].T.astype(cdt)                      # [d, d]
    wqT = params["wq"].T.astype(cdt)                      # [d, d]
    bq = params["bq"].reshape(1, d).astype(jnp.float32)   # [1, d]
    we = params["we"].reshape(1, d).astype(jnp.float32)   # [1, d]

    # ---- Batch-block sizing against the per-core VMEM budget. ----
    in_isz = jnp.dtype(k.dtype).itemsize
    cdt_isz = cdt.itemsize
    mask_isz = jnp.dtype(mask_row.dtype).itemsize

    def footprint(bb):
        per_b_in = (2 * KL * d + T_pad * d) * in_isz + KL * (mask_isz + 4)
        per_b_out = (T_pad * d + T_pad * KL) * cdt_isz
        per_b_scr = KL * d * 4 + T_pad * d * cdt_isz              # kp_s + qp_s
        weights = 2 * (2 * d * d * cdt_isz + 2 * d * 4)
        live = 3 * t_chunk * KL * d * 4                           # tanh block + f32 copy
        return (2 * bb * (per_b_in + per_b_out) + bb * per_b_scr
                + weights + live + (2 << 20))

    try:
        cap = int(getattr(pltpu.get_tpu_info(), "vmem_capacity_bytes", 0)) or (64 << 20)
    except Exception:
        cap = 64 << 20                        # conservative: v7x per-TC VMEM
    budget = (cap * 3) // 4                   # ~48 MiB on v7x, ~96 MiB v5e/v6e

    min_steps = 2 if bs >= 2 else 1           # keep both v7x TensorCores busy
    B_blk = 1
    for cand in range(1, min(bs, 8) + 1):     # cap the batch-loop unroll
        if bs % cand == 0 and bs // cand >= min_steps and footprint(cand) <= budget:
            B_blk = cand
    grid = (bs // B_blk,)
    vmem_bytes = int(min(budget, max(footprint(B_blk) * 5 // 4, 16 << 20)))

    def _kv_spec():
        if kv_buffer_count is None:
            return pl.BlockSpec((B_blk, KL, d), lambda i: (i, 0, 0))
        return pl.BlockSpec((B_blk, KL, d), lambda i: (i, 0, 0),
                            pipeline_mode=pl.Buffered(kv_buffer_count))

    kernel = partial(_combined_attention_kernel, b_blk=B_blk, kl=KL,
                     t_pad=T_pad, t_chunk=t_chunk, n_chunks=n_chunks, d=d)

    ctx_p, alpha_p = pl.pallas_call(
        kernel,
        out_shape=(jax.ShapeDtypeStruct((bs, T_pad, d), cdt),
                   jax.ShapeDtypeStruct((bs, T_pad, KL), cdt)),
        grid=grid,
        in_specs=[
            _kv_spec(),                                             # k
            pl.BlockSpec((B_blk, T_pad, d), lambda i: (i, 0, 0)),   # q (padded)
            _kv_spec(),                                             # v
            pl.BlockSpec((B_blk, 1, KL), lambda i: (i, 0, 0)),      # mask (int)
            pl.BlockSpec((B_blk, 1, KL), lambda i: (i, 0, 0)),      # betas
            pl.BlockSpec((d, d), lambda i: (0, 0)),                 # wkT
            pl.BlockSpec((d, d), lambda i: (0, 0)),                 # wqT
            pl.BlockSpec((1, d), lambda i: (0, 0)),                 # bq
            pl.BlockSpec((1, d), lambda i: (0, 0)),                 # we
        ],
        out_specs=(
            pl.BlockSpec((B_blk, T_pad, d), lambda i: (i, 0, 0)),   # ctx
            pl.BlockSpec((B_blk, T_pad, KL), lambda i: (i, 0, 0)),  # mod alphas
        ),
        scratch_shapes=[
            pltpu.VMEM((B_blk * KL, d), jnp.float32),   # kp (f32 accumulation)
            pltpu.VMEM((B_blk * T_pad, d), cdt),        # qp (compute dtype)
        ],
        compiler_params=pltpu.CompilerParams(
            dimension_semantics=("parallel",),
            vmem_limit_bytes=vmem_bytes),
    )(k2, q2, v2, mask_row, betas_row, wkT, wqT, bq, we)

    if T_pad != T:
        ctx_p = ctx_p[:, :T, :]
        alpha_p = alpha_p[:, :T, :]
    return ctx_p, alpha_p


def reference(k, v, q, mask, betas, params):
    """Pure-JAX f32 reference mirroring the PyTorch forward exactly."""
    bs, K, L, d = k.shape
    T = q.shape[1]
    KL = K * L
    k2 = k.reshape(bs, KL, d)
    v2 = v.reshape(bs, KL, d)
    mask2 = mask.reshape(bs, KL, 1)
    kp = k2 @ params["wk"].T
    qp = q @ params["wq"].T + params["bq"]
    e = jnp.tanh(kp[:, :, None, :] + qp[:, None, :, :])           # [bs, KL, T, d]
    scores = jnp.einsum("bktd,d->bkt", e, params["we"].reshape(-1))
    scores = jnp.where(mask2 == 0, -1e9, scores)
    alphas = jax.nn.softmax(scores, axis=1)                       # over KL
    alphas = alphas.reshape(bs, K, L, T)
    mod = alphas * betas[:, :, None, None]
    mod = mod / jnp.sum(mod, axis=(1, 2), keepdims=True)
    mod = mod.reshape(bs, KL, T).transpose(0, 2, 1)               # [bs, T, KL]
    ctx = mod @ v2
    return ctx, mod


def init_params(key, d):
    ks = jax.random.split(key, 4)
    s = 1.0 / sqrt(d)
    return {
        "wq": jax.random.uniform(ks[0], (d, d), jnp.float32, -s, s),
        "bq": jax.random.uniform(ks[1], (d,), jnp.float32, -s, s),
        "wk": jax.random.uniform(ks[2], (d, d), jnp.float32, -s, s),
        "we": jax.random.uniform(ks[3], (1, d), jnp.float32, -s, s),
    }


def _make_inputs(key, bs, K, L, T, d):
    kk = jax.random.split(key, 5)
    k = jax.random.normal(kk[0], (bs, K, L, d), jnp.float32)
    v = jax.random.normal(kk[1], (bs, K, L, d), jnp.float32)
    q = jax.random.normal(kk[2], (bs, T, d), jnp.float32)
    mask = (jax.random.uniform(kk[3], (bs, K, L, 1)) > 0.2).astype(jnp.int32)
    betas = jax.nn.softmax(jax.random.normal(kk[4], (bs, K), jnp.float32), axis=-1)
    return k, v, q, mask, betas


if __name__ == "__main__":
    key = jax.random.PRNGKey(0)
    k_in, k_params, k_in2 = jax.random.split(key, 3)
    d_model = 32
    params = init_params(k_params, d_model)

    # --- Config 1: f32 (exact-parity / v5e path). T=4 exercises T padding,
    # bs=2 keeps the grid at 2 steps (B_blk=1).
    bs, K, L, T = 2, 2, 8, 4
    k, v, q, mask, betas = _make_inputs(k_in, bs, K, L, T, d_model)
    ctx, alphas = combined_attention(k, v, q, mask, betas, params,
                                     compute_dtype=jnp.float32)
    jax.block_until_ready((ctx, alphas))
    ctx_ref, alphas_ref = reference(k, v, q, mask, betas, params)
    assert ctx.shape == (bs, T, d_model) and alphas.shape == (bs, T, K * L)
    assert jnp.allclose(ctx, ctx_ref, atol=1e-3, rtol=1e-3)
    assert jnp.allclose(alphas, alphas_ref, atol=1e-3, rtol=1e-3)

    # --- Config 2: bf16 operands (v6e/v7x path). bs=8 exercises batch
    # blocking (B_blk=4 -> 2 grid steps); T=16 exercises two T-chunks.
    bs2, K2, L2, T2 = 8, 2, 8, 16
    k2, v2, q2, mask2, betas2 = _make_inputs(k_in2, bs2, K2, L2, T2, d_model)
    ctx2, alphas2 = combined_attention(k2, v2, q2, mask2, betas2, params,
                                       compute_dtype=jnp.bfloat16)
    jax.block_until_ready((ctx2, alphas2))
    ctx_ref2, alphas_ref2 = reference(k2, v2, q2, mask2, betas2, params)
    assert ctx2.shape == (bs2, T2, d_model) and alphas2.shape == (bs2, T2, K2 * L2)
    assert jnp.allclose(ctx2.astype(jnp.float32), ctx_ref2, atol=7e-2, rtol=7e-2)
    assert jnp.allclose(alphas2.astype(jnp.float32), alphas_ref2, atol=7e-2, rtol=7e-2)

    print("KERNEL_OK")
</pallas_src>

<mosaic_0001>
module attributes {stable_mosaic.version = 11 : i64} {
  func.func @_combined_attention_kernel(%arg0: i32, %arg1: memref<1x16x32xf32, #tpu.memory_space<vmem>>, %arg2: memref<1x8x32xf32, #tpu.memory_space<vmem>>, %arg3: memref<1x16x32xf32, #tpu.memory_space<vmem>>, %arg4: memref<1x1x16xi32, #tpu.memory_space<vmem>>, %arg5: memref<1x1x16xf32, #tpu.memory_space<vmem>>, %arg6: memref<32x32xf32, #tpu.memory_space<vmem>>, %arg7: memref<32x32xf32, #tpu.memory_space<vmem>>, %arg8: memref<1x32xf32, #tpu.memory_space<vmem>>, %arg9: memref<1x32xf32, #tpu.memory_space<vmem>>, %arg10: memref<1x8x32xf32, #tpu.memory_space<vmem>>, %arg11: memref<1x8x16xf32, #tpu.memory_space<vmem>>, %arg12: memref<16x32xf32, #tpu.memory_space<vmem>>, %arg13: memref<8x32xf32, #tpu.memory_space<vmem>>) attributes {dimension_semantics = [#tpu.dimension_semantics<parallel>], iteration_bounds = array<i64: 2>, scalar_prefetch = 0 : i64, scratch_operands = 2 : i64, tpu.core_type = #tpu.core_type<tc>, window_params = [{transform_indices = @transform_0, window_bounds = array<i64: 1, 16, 32>}, {transform_indices = @transform_1, window_bounds = array<i64: 1, 8, 32>}, {transform_indices = @transform_2, window_bounds = array<i64: 1, 16, 32>}, {transform_indices = @transform_3, window_bounds = array<i64: 1, 1, 16>}, {transform_indices = @transform_4, window_bounds = array<i64: 1, 1, 16>}, {pipeline_mode = #tpu.pipeline_mode<synchronous>, transform_indices = @transform_5, window_bounds = array<i64: 32, 32>}, {pipeline_mode = #tpu.pipeline_mode<synchronous>, transform_indices = @transform_6, window_bounds = array<i64: 32, 32>}, {pipeline_mode = #tpu.pipeline_mode<synchronous>, transform_indices = @transform_7, window_bounds = array<i64: 1, 32>}, {pipeline_mode = #tpu.pipeline_mode<synchronous>, transform_indices = @transform_8, window_bounds = array<i64: 1, 32>}, {transform_indices = @transform_9, window_bounds = array<i64: 1, 8, 32>}, {transform_indices = @transform_10, window_bounds = array<i64: 1, 8, 16>}]} {
    %c0 = arith.constant 0 : index
    %c0_0 = arith.constant 0 : index
    %c0_1 = arith.constant 0 : index
    %0 = vector.load %arg1[%c0, %c0_0, %c0_1] : memref<1x16x32xf32, #tpu.memory_space<vmem>>, vector<1x16x32xf32>
    %1 = vector.shape_cast %0 : vector<1x16x32xf32> to vector<16x32xf32>
    %c0_2 = arith.constant 0 : index
    %c0_3 = arith.constant 0 : index
    %c0_4 = arith.constant 0 : index
    %2 = vector.load %arg2[%c0_2, %c0_3, %c0_4] : memref<1x8x32xf32, #tpu.memory_space<vmem>>, vector<1x8x32xf32>
    %3 = vector.shape_cast %2 : vector<1x8x32xf32> to vector<8x32xf32>
    %c0_5 = arith.constant 0 : index
    %c0_6 = arith.constant 0 : index
    %4 = vector.load %arg6[%c0_5, %c0_6] : memref<32x32xf32, #tpu.memory_space<vmem>>, vector<32x32xf32>
    %cst = arith.constant dense<0.000000e+00> : vector<16x32xf32>
    %5 = tpu.matmul %1, %4, %cst {dimension_numbers = #tpu.dot_dimension_numbers<[1], [0], [0], [1], [0, 0, 1, 1], [], []>} : vector<16x32xf32>, vector<32x32xf32>, vector<16x32xf32> -> vector<16x32xf32>
    %c0_7 = arith.constant 0 : index
    %c0_8 = arith.constant 0 : index
    %6 = vector.load %arg12[%c0_7, %c0_8] : memref<16x32xf32, #tpu.memory_space<vmem>>, vector<16x32xf32>
    tpu.vector_store %arg12[%c0_7, %c0_8], %5 {strides = array<i32>} : memref<16x32xf32, #tpu.memory_space<vmem>>, vector<16x32xf32>,
    %c0_9 = arith.constant 0 : index
    %c0_10 = arith.constant 0 : index
    %7 = vector.load %arg7[%c0_9, %c0_10] : memref<32x32xf32, #tpu.memory_space<vmem>>, vector<32x32xf32>
    %cst_11 = arith.constant dense<0.000000e+00> : vector<8x32xf32>
    %8 = tpu.matmul %3, %7, %cst_11 {dimension_numbers = #tpu.dot_dimension_numbers<[1], [0], [0], [1], [0, 0, 1, 1], [], []>} : vector<8x32xf32>, vector<32x32xf32>, vector<8x32xf32> -> vector<8x32xf32>
    %c0_12 = arith.constant 0 : index
    %c0_13 = arith.constant 0 : index
    %9 = vector.load %arg8[%c0_12, %c0_13] : memref<1x32xf32, #tpu.memory_space<vmem>>, vector<1x32xf32>
    %10 = vector.broadcast %9 : vector<1x32xf32> to vector<8x32xf32>
    %11 = arith.addf %8, %10 : vector<8x32xf32>
    %c0_14 = arith.constant 0 : index
    %c0_15 = arith.constant 0 : index
    %12 = vector.load %arg13[%c0_14, %c0_15] : memref<8x32xf32, #tpu.memory_space<vmem>>, vector<8x32xf32>
    tpu.vector_store %arg13[%c0_14, %c0_15], %11 {strides = array<i32>} : memref<8x32xf32, #tpu.memory_space<vmem>>, vector<8x32xf32>,
    %c0_16 = arith.constant 0 : index
    %c0_17 = arith.constant 0 : index
    %13 = vector.load %arg9[%c0_16, %c0_17] : memref<1x32xf32, #tpu.memory_space<vmem>>, vector<1x32xf32>
    %14 = vector.shape_cast %13 : vector<1x32xf32> to vector<1x1x32xf32>
    %c0_i32 = arith.constant 0 : i32
    %c16_i32 = arith.constant 16 : i32
    %15 = arith.muli %c0_i32, %c16_i32 : i32
    %16 = tpu.assume_multiple %15, 16 : i32
    %17 = arith.index_cast %16 : i32 to index
    %c0_18 = arith.constant 0 : index
    %18 = vector.load %arg12[%17, %c0_18] : memref<16x32xf32, #tpu.memory_space<vmem>>, vector<16x32xf32>
    %19 = arith.index_cast %c0_i32 : i32 to index
    %c0_19 = arith.constant 0 : index
    %c0_20 = arith.constant 0 : index
    %20 = vector.load %arg3[%19, %c0_19, %c0_20] : memref<1x16x32xf32, #tpu.memory_space<vmem>>, vector<1x16x32xf32>
    %21 = vector.shape_cast %20 : vector<1x16x32xf32> to vector<16x32xf32>
    %22 = arith.index_cast %c0_i32 : i32 to index
    %c0_21 = arith.constant 0 : index
    %c0_22 = arith.constant 0 : index
    %23 = vector.load %arg4[%22, %c0_21, %c0_22] : memref<1x1x16xi32, #tpu.memory_space<vmem>>, vector<1x1x16xi32>
    %24 = vector.shape_cast %23 : vector<1x1x16xi32> to vector<1x16xi32>
    %25 = arith.index_cast %c0_i32 : i32 to index
    %c0_23 = arith.constant 0 : index
    %c0_24 = arith.constant 0 : index
    %26 = vector.load %arg5[%25, %c0_23, %c0_24] : memref<1x1x16xf32, #tpu.memory_space<vmem>>, vector<1x1x16xf32>
    %27 = vector.shape_cast %26 : vector<1x1x16xf32> to vector<1x16xf32>
    %c0_i32_25 = arith.constant 0 : i32
    %c8_i32 = arith.constant 8 : i32
    %28 = arith.muli %c0_i32_25, %c8_i32 : i32
    %29 = tpu.assume_multiple %28, 8 : i32
    %c8_i32_26 = arith.constant 8 : i32
    %30 = arith.muli %c0_i32, %c8_i32_26 : i32
    %31 = arith.addi %30, %29 : i32
    %32 = tpu.assume_multiple %31, 8 : i32
    %33 = arith.index_cast %32 : i32 to index
    %c0_27 = arith.constant 0 : index
    %34 = vector.load %arg13[%33, %c0_27] : memref<8x32xf32, #tpu.memory_space<vmem>>, vector<8x32xf32>
    %35 = vector.shape_cast %34 : vector<8x32xf32> to vector<8x1x32xf32>
    %36 = vector.shape_cast %18 : vector<16x32xf32> to vector<1x16x32xf32>
    %37 = vector.broadcast %35 : vector<8x1x32xf32> to vector<8x16x32xf32>
    %38 = vector.broadcast %36 : vector<1x16x32xf32> to vector<8x16x32xf32>
    %39 = arith.addf %37, %38 : vector<8x16x32xf32>
    %40 = math.tanh %39 : vector<8x16x32xf32>
    %41 = vector.broadcast %14 : vector<1x1x32xf32> to vector<8x16x32xf32>
    %42 = arith.mulf %40, %41 : vector<8x16x32xf32>
    %cst_28 = arith.constant dense<0.000000e+00> : vector<8x16xf32>
    %43 = vector.multi_reduction <add>, %42, %cst_28 [2] : vector<8x16x32xf32> to vector<8x16xf32>
    %c0_i32_29 = arith.constant 0 : i32
    %44 = vector.broadcast %c0_i32_29 : i32 to vector<1x16xi32>
    %45 = arith.cmpi ne, %24, %44 : vector<1x16xi32>
    %cst_30 = arith.constant -1.000000e+09 : f32
    %46 = vector.shape_cast %45 : vector<1x16xi1> to vector<1x16xi1>
    %47 = vector.broadcast %46 : vector<1x16xi1> to vector<8x16xi1>
    %48 = vector.broadcast %cst_30 : f32 to vector<8x16xf32>
    %49 = arith.select %47, %43, %48 : vector<8x16xi1>, vector<8x16xf32>
    %cst_31 = arith.constant dense<0xFF800000> : vector<8xf32>
    %50 = vector.multi_reduction <maximumf>, %49, %cst_31 [1] : vector<8x16xf32> to vector<8xf32>
    %51 = vector.shape_cast %50 : vector<8xf32> to vector<8x1xf32>
    %52 = vector.broadcast %51 : vector<8x1xf32> to vector<8x16xf32>
    %53 = arith.subf %49, %52 : vector<8x16xf32>
    %54 = math.exp %53 : vector<8x16xf32>
    %55 = vector.broadcast %27 : vector<1x16xf32> to vector<8x16xf32>
    %56 = arith.mulf %54, %55 : vector<8x16xf32>
    %cst_32 = arith.constant dense<0.000000e+00> : vector<8xf32>
    %57 = vector.multi_reduction <add>, %56, %cst_32 [1] : vector<8x16xf32> to vector<8xf32>
    %58 = vector.shape_cast %57 : vector<8xf32> to vector<8x1xf32>
    %59 = tpu.reciprocal %58 {approx = true} : vector<8x1xf32> -> vector<8x1xf32>
    %60 = arith.mulf %58, %59 : vector<8x1xf32>
    %cst_33 = arith.constant 2.000000e+00 : f32
    %61 = vector.broadcast %cst_33 : f32 to vector<8x1xf32>
    %62 = arith.subf %61, %60 : vector<8x1xf32>
    %63 = arith.mulf %59, %62 : vector<8x1xf32>
    %64 = vector.broadcast %63 : vector<8x1xf32> to vector<8x16xf32>
    %65 = arith.mulf %56, %64 : vector<8x16xf32>
    %cst_34 = arith.constant dense<0.000000e+00> : vector<8x32xf32>
    %66 = tpu.matmul %65, %21, %cst_34 {dimension_numbers = #tpu.dot_dimension_numbers<[1], [0], [0], [1], [0, 0, 1, 1], [], []>} : vector<8x16xf32>, vector<16x32xf32>, vector<8x32xf32> -> vector<8x32xf32>
    %67 = arith.index_cast %c0_i32 : i32 to index
    %68 = arith.index_cast %29 : i32 to index
    %c0_35 = arith.constant 0 : index
    %69 = vector.load %arg10[%67, %68, %c0_35] : memref<1x8x32xf32, #tpu.memory_space<vmem>>, vector<1x8x32xf32>
    %70 = vector.shape_cast %69 : vector<1x8x32xf32> to vector<8x32xf32>
    %71 = vector.shape_cast %66 : vector<8x32xf32> to vector<1x8x32xf32>
    tpu.vector_store %arg10[%67, %68, %c0_35], %71 {strides = array<i32>} : memref<1x8x32xf32, #tpu.memory_space<vmem>>, vector<1x8x32xf32>,
    %72 = arith.index_cast %c0_i32 : i32 to index
    %73 = arith.index_cast %29 : i32 to index
    %c0_36 = arith.constant 0 : index
    %74 = vector.load %arg11[%72, %73, %c0_36] : memref<1x8x16xf32, #tpu.memory_space<vmem>>, vector<1x8x16xf32>
    %75 = vector.shape_cast %74 : vector<1x8x16xf32> to vector<8x16xf32>
    %76 = vector.shape_cast %65 : vector<8x16xf32> to vector<1x8x16xf32>
    tpu.vector_store %arg11[%72, %73, %c0_36], %76 {strides = array<i32>} : memref<1x8x16xf32, #tpu.memory_space<vmem>>, vector<1x8x16xf32>,
    %c1_i32 = arith.constant 1 : i32
    %c1_i32_37 = arith.constant 1 : i32
    return
  }
  func.func @transform_0(%arg0: i32) -> (i32, i32, i32) {
    %c0_i32 = arith.constant 0 : i32
    %c0_i32_0 = arith.constant 0 : i32
    %c0_i32_1 = arith.constant 0 : i32
    return %arg0, %c0_i32, %c0_i32_0 : i32, i32, i32
  }
  func.func @transform_1(%arg0: i32) -> (i32, i32, i32) {
    %c0_i32 = arith.constant 0 : i32
    %c0_i32_0 = arith.constant 0 : i32
    %c0_i32_1 = arith.constant 0 : i32
    return %arg0, %c0_i32, %c0_i32_0 : i32, i32, i32
  }
  func.func @transform_2(%arg0: i32) -> (i32, i32, i32) {
    %c0_i32 = arith.constant 0 : i32
    %c0_i32_0 = arith.constant 0 : i32
    %c0_i32_1 = arith.constant 0 : i32
    return %arg0, %c0_i32, %c0_i32_0 : i32, i32, i32
  }
  func.func @transform_3(%arg0: i32) -> (i32, i32, i32) {
    %c0_i32 = arith.constant 0 : i32
    %c0_i32_0 = arith.constant 0 : i32
    %c0_i32_1 = arith.constant 0 : i32
    return %arg0, %c0_i32, %c0_i32_0 : i32, i32, i32
  }
  func.func @transform_4(%arg0: i32) -> (i32, i32, i32) {
    %c0_i32 = arith.constant 0 : i32
    %c0_i32_0 = arith.constant 0 : i32
    %c0_i32_1 = arith.constant 0 : i32
    return %arg0, %c0_i32, %c0_i32_0 : i32, i32, i32
  }
  func.func @transform_5(%arg0: i32) -> (i32, i32) {
    %c0_i32 = arith.constant 0 : i32
    %c0_i32_0 = arith.constant 0 : i32
    %c0_i32_1 = arith.constant 0 : i32
    return %c0_i32, %c0_i32_0 : i32, i32
  }
  func.func @transform_6(%arg0: i32) -> (i32, i32) {
    %c0_i32 = arith.constant 0 : i32
    %c0_i32_0 = arith.constant 0 : i32
    %c0_i32_1 = arith.constant 0 : i32
    return %c0_i32, %c0_i32_0 : i32, i32
  }
  func.func @transform_7(%arg0: i32) -> (i32, i32) {
    %c0_i32 = arith.constant 0 : i32
    %c0_i32_0 = arith.constant 0 : i32
    %c0_i32_1 = arith.constant 0 : i32
    return %c0_i32, %c0_i32_0 : i32, i32
  }
  func.func @transform_8(%arg0: i32) -> (i32, i32) {
    %c0_i32 = arith.constant 0 : i32
    %c0_i32_0 = arith.constant 0 : i32
    %c0_i32_1 = arith.constant 0 : i32
    return %c0_i32, %c0_i32_0 : i32, i32
  }
  func.func @transform_9(%arg0: i32) -> (i32, i32, i32) {
    %c0_i32 = arith.constant 0 : i32
    %c0_i32_0 = arith.constant 0 : i32
    %c0_i32_1 = arith.constant 0 : i32
    return %arg0, %c0_i32, %c0_i32_0 : i32, i32, i32
  }
  func.func @transform_10(%arg0: i32) -> (i32, i32, i32) {
    %c0_i32 = arith.constant 0 : i32
    %c0_i32_0 = arith.constant 0 : i32
    %c0_i32_1 = arith.constant 0 : i32
    return %arg0, %c0_i32, %c0_i32_0 : i32, i32, i32
  }
}

</mosaic_0001>

<bundles_post_ra>
// kernel: tpu_custom_call.1
= control target key start
LH: loop header
LB: loop body
LE: loop exit
PB: predicated region body
PF: predicated region fallthrough
CT: control target
= control target key end

     0   :  { %s2340_s0 = inlined_call_operand.hbm [shape: f32[2,16,32], index: 0, kind: input, shape index: {}]   ;;  %s2341_s1 = inlined_call_operand.hbm [shape: f32[2,8,32], index: 1, kind: input, shape index: {}]   ;;  %s2342_s2 = inlined_call_operand.hbm [shape: f32[2,16,32], index: 2, kind: input, shape index: {}]   ;;  %s2343_s3 = inlined_call_operand.vmem [shape: s32[2,1,16], index: 3, kind: input, shape index: {}]   ;;  %s2344_s4 = inlined_call_operand.vmem [shape: f32[2,1,16], index: 4, kind: input, shape index: {}]   ;;  %s2345_s5 = inlined_call_operand.hbm [shape: f32[32,32], index: 5, kind: input, shape index: {}]   ;;  %s2346_s6 = inlined_call_operand.hbm [shape: f32[32,32], index: 6, kind: input, shape index: {}]   ;;  %s2347_s7 = inlined_call_operand.vmem [shape: f32[1,32], index: 7, kind: input, shape index: {}]   ;;  %s2348_s8 = inlined_call_operand.vmem [shape: f32[1,32], index: 8, kind: input, shape index: {}]   ;;  %s2349_s9 = inlined_call_operand.hbm [shape: f32[2,8,32], index: 9, kind: output, shape index: {0}]   ;;  %s2350_s10 = inlined_call_operand.hbm [shape: f32[2,8,16], index: 10, kind: output, shape index: {1}]  }
   0x1   :  { %2372 = sst [smem:[#allocation26_spill]] %s2341_s1 }
   0x2   :  { %2373 = sst [smem:[#allocation27_spill]] %s2345_s5 }
   0x3   :  { %2374 = sst [smem:[#allocation28_spill]] %s2346_s6 }
   0x4   :  { %2375 = sst [smem:[#allocation29_spill]] %s2349_s9 }
   0x5   :  { %16 = vsyncpa [#allocation5], 0 }
   0x6   :  { %18 = vsyncpa [#allocation5 + $0x1], 0 }
   0x7   :  { %19 = vsyncpa [#allocation8], 0 }
   0x8   :  { %21 = vsyncpa [#allocation8 + $0x1], 0 }
   0x9   :  { %22 = vsyncpa [#allocation11], 0 }
   0xa   :  { %23 = vsyncpa [#allocation6], 0 }
   0xb   :  { %25 = vsyncpa [#allocation6 + $0x1], 0 }
   0xc   :  { %26 = vsyncpa [#allocation15], 0 }
   0xd   :  { %28 = vsyncpa [#allocation15 + $0x1], 0  ;;  %s1867_s13 = smov 0   ;;  %s1869_s14 = smov 0  }
   0xe   :  { %s1871_s15 = smov 0   ;;  %s1873_s16 = smov 0  }
   0xf LB: > { %2376 = sst [smem:[#allocation21_spill]] %s1784_s13  ;;  %s1888_s17 = sadd.s32 4294967295, %s1796_s16   ;;  %s1796_s16 = sphi %s1873_s16, %s2411_s16   ;;  %s1792_s15 = sphi %s1871_s15, %s2413_s15   ;;  %s1788_s14 = sphi %s1869_s14, %s2415_s14   ;;  %s1784_s13 = sphi %s1867_s13, %s2414_s13  }
  0x10   : > { %2377 = sst [smem:[#allocation22_spill]] %s1792_s15  ;;  %s1322_s18 = sadd.s32 4294967294, %s1796_s16  }
  0x11   : > { %p54_p0 = scmp.ne.s32.totalorder %s1788_s14, %s1784_s13  ;;  %p2351_p1 = scmp.eq.s32.totalorder %s1888_s17, 0 }
  0x12   : > { %p272_p3 = scmp.eq.s32.totalorder %s1322_s18, 1  ;;  %p1323_p5 = scmp.ge.s32.totalorder %s1796_s16, 1 }
  0x13   : > { %p1897_p4 = por %p2351_p1, %p54_p0  ;;  %p305_p7 = scmp.lt.s32.totalorder %s1796_s16, 3 }
  0x14   : > { %p1902_p6 = por %p272_p3, %p54_p0  ;;  %s1798_s22 = smov [#allocation10]  }
  0x15   : > { %s2378_s19 = scalar_select %p1897_p4, 1, 0 }
  0x16   : > { %s2379_s20 = scalar_select %p1902_p6, 1, 0 }
  0x17   : > { %p1907_p8 = pnand %p1323_p5, %p305_p7  ;;  %s317_s23 = sshll.u32 %s1798_s22, 4  ;;  %s1911_s23 = int_to_ptr.vmem [resolvable:$true] %s317_s23 }
  0x18   : > { %2380 = sst [smem:[#allocation23_spill]] %s2379_s20  ;;  %s1923_s25 = sadd.s32 1, %s1796_s16  }
  0x19   : > { %s2381_s21 = scalar_select %p1907_p8, 1, 0 }
  0x1a   : > { %p1436_p9 = pneg %p1907_p8  ;;  %2383 = sst [smem:[#allocation24_spill]] %s1923_s25 }
  0x1b   : > { %s41_s26 = sadd.s32 1, %s1792_s15  ;;  %s38_s27 = ssub.s32 %s1796_s16, %s1923_s25 }
  0x1c   : > { %p1918_p11 = pnand %p1436_p9, %p2351_p1  ;;  %s2384_s5 = sld [smem:[#allocation27_spill]] }
  0x1e   : > { %s2382_s24 = scalar_select %p1918_p11, 1, 0 }
  0x1f   : > { %p2360_p13 = pneg %p1918_p11 }
  0x22   : > { %s1544_s30 = scalar_lea.hbm %s2384_s5, 512 }
  0x23   : > { %p1545_p12 = scmp.ne.s32.totalorder %s2384_s5, %s1544_s30  ;;  %p1551_p5 = scmp.lt.u32.totalorder %s1544_s30, %s2384_s5 }
  0x25   : > { %p1547_p0 = pnand %p2360_p13, %p1545_p12 }
  0x27   : > { %p1548_p3 = pneg %p1547_p0 }
  0x29   : > { %p1553_p7 = pnand %p1551_p5, %p1548_p3 }
  0x2b   : > { %1556 = shalt.err (!%p1553_p7)
}
  0x2c   : > { %s1557_s28 = scalar_lea.vmem %s1911_s23, 512  ;;  %p1565_p2 = scmp.lt.s32.totalorder %s1911_s23, %s1911_s23 }
  0x2d   : > { %p1558_p9 = scmp.ne.s32.totalorder %s1911_s23, %s1557_s28  ;;  %p1566_p12 = scmp.lt.s32.totalorder %s1557_s28, %s1557_s28 }
  0x2f   : > { %p1560_p10 = pnand %p1558_p9, %p2360_p13  ;;  %p1567_p0 = por %p1566_p12, %p1565_p2 }
  0x31   : > { %p1561_p1 = pneg %p1560_p10 }
  0x33   : > { %p1568_p6 = pnand %p1567_p0, %p1561_p1 }
  0x35   : > { %1571 = shalt.err (!%p1568_p6)
}
  0x36   : > { %s2355_s29 = smov 128   ;;  %s2357_s30 = smov 8  }
  0x37   : > { %1439 = dma.hbm_to_vmem [thread:$0]  (!%p1918_p11), %s2384_s5, 512, %s1911_s23, [#allocation11], %s2355_s29, %s2355_s29, %s2357_s30  }
  0x38   : > { %p39_p1 = scmp.eq.s32.totalorder %s38_s27, 0  ;;  %p48_p2 = scmp.ne.s32.totalorder %s1792_s15, %s1788_s14 }
  0x39   : > { %p49_p6 = scmp.eq.s32.totalorder %s1796_s16, 0  ;;  %p1462_p10 = scmp.lt.s32.totalorder %s1796_s16, 2 }
  0x3a   : > { %s1963_s18 = scalar_select %p39_p1, %s1792_s15, %s41_s26  }
  0x3b   : > { %p50_p3 = por %p49_p6, %p48_p2  ;;  %p2386_p5 = scmp.eq.s32.totalorder %s1888_s17, 1 }
  0x3c   : > { %2385 = sst [smem:[#allocation25_spill]] %s1963_s18  ;;  %s1972_s28 = sand.u32 1, %s1792_s15  }
  0x3d   : > { %p1967_p7 = por %p2386_p5, %p48_p2  ;;  %s371_s25 = sand.u32 1, %s1796_s16  }
  0x3e   : > { %p1976_p9 = pnand %p1462_p10, %p50_p3  ;;  %s1330_s27 = sshll.u32 %s1972_s28, 3 }
  0x3f   : > { %s2387_s22 = scalar_select %p1967_p7, 1, 0 }
  0x40   : > { %s2388_s23 = scalar_select %p1976_p9, 1, 0 }
  0x41   : > { %s1331_s26 = sshll.u32 %s1796_s16, 7  ;;  %s375_s11 = scalar_lea.vmem [#allocation7], %s1330_s27 }
  0x42   : > { %s382_s12 = sshll.u32 %s375_s11, 4  ;;  %s2389_s1 = sld [smem:[#allocation26_spill]]  ;;  %s1987_s12 = int_to_ptr.vmem [resolvable:$true] %s382_s12 }
  0x43   : > { %s1989_s20 = scalar_lea.sflag [#allocation8], %s371_s25  ;;  %p1995_p0 = pneg %p1976_p9 }
  0x45   : > { %s2390_s15 = scalar_select %p1995_p0, 1, 0 }
  0x48   : > { %s1985_s5 = scalar_lea.hbm %s2389_s1, %s1331_s26  ;;  %s1577_s27 = scalar_lea.hbm %s2389_s1, 256 }
  0x49   : > { %s1572_s18 = scalar_lea.hbm %s1985_s5, 128  ;;  %p1578_p6 = scmp.lt.u32.totalorder %s1985_s5, %s2389_s1 }
  0x4a   : > { %p1573_p12 = scmp.ne.s32.totalorder %s1985_s5, %s1572_s18  ;;  %p1579_p10 = scmp.lt.u32.totalorder %s1577_s27, %s1572_s18 }
  0x4b   : > { %p1581_p5 = scmp.lt.u32.totalorder %s1572_s18, %s1985_s5 }
  0x4c   : > { %p1575_p1 = pnand %p1995_p0, %p1573_p12  ;;  %p1580_p3 = por %p1579_p10, %p1578_p6 }
  0x4e   : > { %p1576_p2 = pneg %p1575_p1  ;;  %p1582_p13 = por %p1581_p5, %p1580_p3 }
  0x50   : > { %p1583_p7 = pnand %p1582_p13, %p1576_p2 }
  0x52   : > { %1586 = shalt.err (!%p1583_p7)
}
  0x53   : > { %s1587_s25 = scalar_lea.vmem %s1987_s12, 128  ;;  %s1801_s29 = smov [#allocation7]  }
  0x54   : > { %p1588_p12 = scmp.ne.s32.totalorder %s1987_s12, %s1587_s25  ;;  %s1592_s30 = sshll.u32 %s1801_s29, 4  ;;  %s1593_s30 = int_to_ptr.vmem [resolvable:$false] %s1592_s30 }
  0x55   : > { %s1594_s26 = scalar_lea.vmem %s1593_s30, 256  ;;  %p1595_p8 = scmp.lt.s32.totalorder %s1987_s12, %s1593_s30 }
  0x56   : > { %p1590_p1 = pnand %p1588_p12, %p1995_p0  ;;  %p1596_p11 = scmp.lt.s32.totalorder %s1594_s26, %s1587_s25 }
  0x58   : > { %p1591_p4 = pneg %p1590_p1  ;;  %p1597_p6 = por %p1596_p11, %p1595_p8 }
  0x5a   : > { %p1598_p10 = pnand %p1597_p6, %p1591_p4 }
  0x5c   : > { %1601 = shalt.err (!%p1598_p10)
}
  0x5d   : > { %1449 = dma.hbm_to_vmem [thread:$0]  (!%p1976_p9), %s1985_s5, 128, %s1987_s12, %s1989_s20  }
  0x5e   : > { %s2391_s18 = sshll.u32 %s1972_s28, 4  ;;  %s1802_s1 = smov [#allocation12]  }
  0x5f   : > { %s393_s27 = scalar_lea.vmem [#allocation9], %s2391_s18  ;;  %s330_s29 = sshll.u32 %s1802_s1, 4  ;;  %s331_s29 = int_to_ptr.vmem [resolvable:$true] %s330_s29 }
  0x60   : > { %s400_s11 = sshll.u32 %s393_s27, 4  ;;  %s2392_s6 = sld [smem:[#allocation28_spill]]  ;;  %s2021_s11 = int_to_ptr.vmem [resolvable:$true] %s400_s11 }
  0x61   : > { %p2393_p8 = scmp.ne.s32.totalorder %s2382_s24, 0 }
  0x63   : > { %p2394_p11 = pneg %p2393_p8 }
  0x66   : > { %s1602_s26 = scalar_lea.hbm %s2392_s6, 512 }
  0x67   : > { %p1603_p4 = scmp.ne.s32.totalorder %s2392_s6, %s1602_s26  ;;  %p1609_p2 = scmp.lt.u32.totalorder %s1602_s26, %s2392_s6 }
  0x69   : > { %p1605_p13 = pnand %p1603_p4, %p2394_p11 }
  0x6b   : > { %p1606_p7 = pneg %p1605_p13 }
  0x6d   : > { %p1611_p3 = pnand %p1609_p2, %p1606_p7 }
  0x6f   : > { %1614 = shalt.err (!%p1611_p3)
}
  0x70   : > { %s1615_s1 = scalar_lea.vmem %s331_s29, 512  ;;  %p2395_p12 = pmov %p2394_p11 }
  0x71   : > { %p1616_p5 = scmp.ne.s32.totalorder %s331_s29, %s1615_s1  ;;  %p1623_p10 = scmp.lt.s32.totalorder %s331_s29, %s331_s29 }
  0x72   : > { %p1624_p9 = scmp.lt.s32.totalorder %s1615_s1, %s1615_s1 }
  0x73   : > { %p1618_p1 = pnand %p1616_p5, %p2395_p12 }
  0x74   : > { %p1625_p0 = por %p1624_p9, %p1623_p10 }
  0x75   : > { %p1619_p6 = pneg %p1618_p1 }
  0x77   : > { %p1626_p4 = pnand %p1625_p0, %p1619_p6 }
  0x79   : > { %1629 = shalt.err (!%p1626_p4)
}
  0x7a   : > { %s2396_s9 = smov 8   ;;  %s2397_s13 = smov 128  }
  0x7b   : > { %1442 = dma.hbm_to_vmem [thread:$0]  (!%p2393_p8), %s2392_s6, 512, %s331_s29, [#allocation11], %s2397_s13, %s2397_s13, %s2396_s9  }
  0x7c   : > { %s1356_s25 = sshll.u32 %s1796_s16, 8  ;;  %s2398_s30 = sshll.u32 %s1972_s28, 4 }
  0x7d   : > { %s354_s26 = scalar_lea.vmem [#allocation4], %s2398_s30  ;;  %s2054_s24 = scalar_lea.hbm %s2340_s0, %s1356_s25 }
  0x7e   : > { %s361_s5 = sshll.u32 %s354_s26, 4  ;;  %s351_s18 = scalar_lea.sflag [#allocation5], %s1972_s28  ;;  %s2056_s5 = int_to_ptr.vmem [resolvable:$true] %s361_s5 }
  0x7f   : > { %s1630_s27 = scalar_lea.hbm %s2054_s24, 256  ;;  %p2399_p0 = scmp.ne.s32.totalorder %s2390_s15, 0 }
  0x80   : > { %p1631_p9 = scmp.ne.s32.totalorder %s2054_s24, %s1630_s27  ;;  %s1635_s26 = scalar_lea.hbm %s2340_s0, 512 }
  0x81   : > { %p1636_p13 = scmp.lt.u32.totalorder %s2054_s24, %s2340_s0  ;;  %p1637_p7 = scmp.lt.u32.totalorder %s1635_s26, %s1630_s27 }
  0x82   : > { %p1633_p8 = pnand %p1631_p9, %p2399_p0  ;;  %p1639_p3 = scmp.lt.u32.totalorder %s1630_s27, %s2054_s24 }
  0x83   : > { %p1638_p2 = por %p1637_p7, %p1636_p13 }
  0x84   : > { %p1634_p11 = pneg %p1633_p8 }
  0x85   : > { %p1640_p5 = por %p1639_p3, %p1638_p2 }
  0x87   : > { %p1641_p12 = pnand %p1640_p5, %p1634_p11 }
  0x89   : > { %1644 = shalt.err (!%p1641_p12)
}
  0x8a   : > { %s1645_s1 = scalar_lea.vmem %s2056_s5, 256  ;;  %s1803_s29 = smov [#allocation4]  }
  0x8b   : > { %p1646_p1 = scmp.ne.s32.totalorder %s2056_s5, %s1645_s1  ;;  %s1650_s30 = sshll.u32 %s1803_s29, 4  ;;  %s1651_s30 = int_to_ptr.vmem [resolvable:$false] %s1650_s30 }
  0x8c   : > { %s1652_s6 = scalar_lea.vmem %s1651_s30, 512  ;;  %p1653_p4 = scmp.lt.s32.totalorder %s2056_s5, %s1651_s30 }
  0x8d   : > { %p1648_p6 = pnand %p1646_p1, %p2399_p0  ;;  %p1654_p9 = scmp.lt.s32.totalorder %s1652_s6, %s1645_s1 }
  0x8f   : > { %p1649_p10 = pneg %p1648_p6  ;;  %p1655_p8 = por %p1654_p9, %p1653_p4 }
  0x91   : > { %p1656_p13 = pnand %p1655_p8, %p1649_p10 }
  0x93   : > { %1659 = shalt.err (!%p1656_p13)
}
  0x94   : > { %p2400_p11 = scmp.ne.s32.totalorder %s2388_s23, 0  ;;  %s2090_s12 = scalar_lea.hbm %s2342_s2, %s1356_s25 }
  0x95   : > { %s1660_s1 = scalar_lea.hbm %s2090_s12, 256  ;;  %s1665_s30 = scalar_lea.hbm %s2342_s2, 512 }
  0x96   : > { %1446 = dma.hbm_to_vmem [thread:$0]  (!%p2400_p11), %s2054_s24, 256, %s2056_s5, %s351_s18, %s2397_s13, %s2397_s13, %s2396_s9  }
  0x97   : > { %p1661_p7 = scmp.ne.s32.totalorder %s2090_s12, %s1660_s1  ;;  %p1666_p5 = scmp.lt.u32.totalorder %s2090_s12, %s2342_s2 }
  0x98   : > { %p1667_p12 = scmp.lt.u32.totalorder %s1665_s30, %s1660_s1  ;;  %p1669_p6 = scmp.lt.u32.totalorder %s1660_s1, %s2090_s12 }
  0x99   : > { %p1663_p2 = pnand %p1661_p7, %p2399_p0 }
  0x9a   : > { %p1668_p1 = por %p1667_p12, %p1666_p5 }
  0x9b   : > { %p1664_p3 = pneg %p1663_p2 }
  0x9c   : > { %p1670_p10 = por %p1669_p6, %p1668_p1 }
  0x9e   : > { %p1671_p4 = pnand %p1670_p10, %p1664_p3 }
  0xa0   : > { %1674 = shalt.err (!%p1671_p4)
}
  0xa1   : > { %s1675_s25 = scalar_lea.vmem %s2021_s11, 256  ;;  %s1804_s18 = smov [#allocation9]  }
  0xa2   : > { %p1676_p9 = scmp.ne.s32.totalorder %s2021_s11, %s1675_s25  ;;  %s1680_s6 = sshll.u32 %s1804_s18, 4  ;;  %s1681_s6 = int_to_ptr.vmem [resolvable:$false] %s1680_s6 }
  0xa3   : > { %s1682_s27 = scalar_lea.vmem %s1681_s6, 512  ;;  %p1683_p7 = scmp.lt.s32.totalorder %s2021_s11, %s1681_s6 }
  0xa4   : > { %p1678_p8 = pnand %p1676_p9, %p2399_p0  ;;  %p1684_p2 = scmp.lt.s32.totalorder %s1682_s27, %s1675_s25 }
  0xa6   : > { %p1679_p13 = pneg %p1678_p8  ;;  %p1685_p5 = por %p1684_p2, %p1683_p7 }
  0xa8   : > { %p1686_p12 = pnand %p1685_p5, %p1679_p13 }
  0xaa   : > { %1689 = shalt.err (!%p1686_p12)
}
  0xab   : > { %1452 = dma.hbm_to_vmem [thread:$0]  (!%p2400_p11), %s2090_s12, 256, %s2021_s11, %s1989_s20, %s2397_s13, %s2397_s13, %s2396_s9  }
  0xac   : > { %p2401_p0 = scmp.ne.s32.totalorder %s2381_s21, 0 }
  0xad   : > { %s2120_s15 = sand.u32 (!%p2401_p0), 1, %s1788_s14   ;;  %p2402_p3 = scmp.ne.s32.totalorder (!%p2401_p0), %s2378_s19, 0 }
  0xae   : > { %424 = sbr.rel (%p2401_p0) target bundleno = 1167 (0x48f), region = 56  ;;  %s1336_s26 = sshll.u32 (!%p2401_p0), %s2120_s15, 4 }
  0xaf   : > { %s427_s1 = scalar_lea.sflag (!%p2401_p0), [#allocation5], %s2120_s15  ;;  %s2124_s28 = scalar_lea.vmem (!%p2401_p0), [#allocation4], %s1336_s26 }
  0xb5   : > { %1763 = dma.done.wait (%p2402_p3), %s427_s1, 256  }
  0xb6   : > { %1765 = vsyncadd (%p2402_p3), %s427_s1, 4294967040  ;;  %s435_s20 = sand.u32 1, %s1888_s17   ;;  %s2132_s21 = sshll.u32 %s2120_s15, 3 }
  0xb7   : > { %s436_s23 = scalar_lea.sflag [#allocation8], %s435_s20  ;;  %s439_s11 = scalar_lea.vmem [#allocation7], %s2132_s21 }
  0xb8   : > { %1767 = dma.done.wait (%p2402_p3), %s436_s23, 384  }
  0xb9   : > { %1769 = vsyncadd (%p2402_p3), %s436_s23, 4294966912  ;;  %s2139_s9 = scalar_lea.vmem [#allocation9], %s1336_s26  ;;  %p2403_p11 = scmp.eq.s32.totalorder %s1888_s17, 0 }
  0xbb   : > { %1771 = dma.done.wait (%p2403_p11), [#allocation11], 1024   ;;  %p2404_p1 = pmov %p2403_p11 }
  0xbc   : > { %v1805_v0 = vmov 0.0|0.0   ;;  %vm1806_vm0 = vmmov 0   ;;  %v1807_v1 = vmov 0.0   ;;  %v611_v2 = vld [vmem:[#allocation12] sm:$0xff]  ;;  %v612_v3 = vld [vmem:[#allocation12 + $0x8] sm:$0xff]  ;;  %v613_v4 = vld [vmem:[#allocation12 + $0x10] sm:$0xff]  ;;  %v709_v20 = vlaneseq }
  0xbd   : > { %1773 = vsyncadd (%p2404_p1), [#allocation11], 4294966272  ;;  %1409 = vmatprep.subr.bf16.mxu1 %v1805_v0  ;;  %1391 = vmatprep.mubr.msk.f32.mxu1 %vm1806_vm0, %v1807_v1  ;;  %v1410_v5 = vpack.c.bf16 %v612_v3, %v611_v2  ;;  %v614_v6 = vld [vmem:[#allocation12 + $0x18] sm:$0xff]  ;;  %v523_v7 = vld [vmem:[#allocation10] sm:$0xff]  ;;  %vm527_vm1 = vcmask 261120   ;;  %p514_p6 = scmp.lt.s32.totalorder %s1888_s17, 1 }
  0xbe   : > { %v524_v8 = vld [vmem:[#allocation10 + $0x8] sm:$0xff]  ;;  %v525_v10 = vld [vmem:[#allocation10 + $0x10] sm:$0xff]  ;;  %v526_v11 = vld [vmem:[#allocation10 + $0x18] sm:$0xff]  ;;  %v1413_v12 = vpack.c.bf16 %v614_v6, %v613_v4  ;;  %v1808_v18 = vmov 1966171168   ;;  %v2160_v27 = vshrl.u32 %v709_v20, 7 }
  0xbf   : > { %v1401_v9 = vpack.c.bf16 %v524_v8, %v523_v7  ;;  %1411 = vmatpush3.bf16.msra.mxu1 %v1410_v5  ;;  %v1405_v13 = vpack.c.bf16 %v526_v11, %v525_v10  ;;  %v520_v14 = vld [vmem:[%s2124_s28] sm:$0xff]  ;;  %v521_v16 = vld [vmem:[%s2124_s28 + $0x8] sm:$0xff]  ;;  %v707_v19 = vunpack.c.l.s4 %v1808_v18  ;;  %s2235_s30 = scalar_select %p514_p6, %s1888_s17, 1  ;;  %vm930_vm2 = vcmask 130112  }
  0xc0   : > { %1412 = vmatprep.subr.bf16.mxu1 %v1805_v0  ;;  %1380 = vmatprep.mubr.msk.f32.mxu0 %vm527_vm1, %v520_v14  ;;  %v522_v15 = vld [vmem:[%s439_s11] sm:$0xff]  ;;  %v2165_v32 = vsub.s32 0, %v2160_v27  ;;  %vm995_vm4 = vcmask 1041409   ;;  %vm997_vm5 = vcmask 1042434   ;;  %vm999_vm6 = vcmask 1043459   ;;  %s513_s26 = scalar_lea.vmem [#allocation14], %s2132_s21 }
  0xc1   : > { %1402 = vmatprep.subr.bf16.mxu0 %v1401_v9  ;;  %v1345_v17 = vld [vmem:[%s2347_s7] ss:$0 sm:$0xff]  ;;  %v708_v26 = vunpack.c.0.s8 %v707_v19  ;;  %s516_s25 = scalar_lea.vmem %s2343_s3, %s2235_s30  ;;  %vm1001_vm7 = vcmask 1044484   ;;  %vm1003_vm8 = vcmask 1045509   ;;  %vm1005_vm9 = vcmask 1046534   ;;  %s519_s27 = scalar_lea.vmem %s2344_s4, %s2235_s30 }
  0xc2   : > { %1404 = vmatpush3.bf16.msra.mxu0 %v1401_v9  ;;  %v2187_v57 = vld [vmem:[%s2348_s8] ss:$0 sm:$0xff]  ;;  %vm1007_vm10 = vcmask 1047559   ;;  %vm1011_vm12 = vcmask 130048   ;;  %s1352_s1 = sshll.u32 %s1888_s17, 7  ;;  %s1140_s11 = sshll.u32 %s513_s26, 4  ;;  %s1141_s11 = int_to_ptr.vmem [resolvable:$true] %s1140_s11 }
  0xc3   : > { %1406 = vmatprep.subr.bf16.mxu0 %v1405_v13  ;;  %1414 = vmatpush3.bf16.msra.mxu1 %v1413_v12  ;;  %v711_v28 = vsub.s32 %v708_v26, %v2160_v27  ;;  %s2269_s23 = scalar_lea.hbm %s2350_s10, %s1352_s1  ;;  %s1690_s19 = scalar_lea.vmem %s1141_s11, 128 }
  0xc4   : > { %p1691_p10 = scmp.ne.s32.totalorder %s1141_s11, %s1690_s19  ;;  %p2405_p4 = scmp.ne.s32.totalorder %s2387_s22, 0 }
  0xc5   : > { %s1810_s13 = smov [#allocation14]  }
  0xc6   : > { %1408 = vmatpush3.bf16.msra.mxu0 %v1405_v13  ;;  %1392 = vmatmul.mubr.msk.f32.vlgmr.msra.gmra.mrb[0].mxu1 %vm527_vm1, %v522_v15  ;;  %p1692_p9 = pnand %p1691_p10, %p2405_p4  ;;  %s1694_s12 = sshll.u32 %s1810_s13, 4  ;;  %s1695_s12 = int_to_ptr.vmem [resolvable:$false] %s1694_s12 }
  0xc7   : > { %1415 = vmatprep.subr.bf16.mxu0 %v1805_v0  ;;  %s1696_s29 = scalar_lea.vmem %s1695_s12, 256  ;;  %p1697_p13 = scmp.lt.s32.totalorder %s1141_s11, %s1695_s12 }
  0xc8   : > { %p1693_p8 = pneg %p1692_p9  ;;  %p1698_p7 = scmp.lt.s32.totalorder %s1696_s29, %s1690_s19 }
  0xc9   : > { %1381 = vmatmul.mubr.msk.f32.vlgmr.msra.gmra.mrb[0].mxu0 %vm527_vm1, %v521_v16 }
  0xca   : > { %1398 = vmatprep.mubr.msk.f32.mxu0 %vm1806_vm0, %v1807_v1  ;;  %p1699_p2 = por %p1698_p7, %p1697_p13 }
  0xcc   : > { %p1700_p5 = pnand %p1699_p2, %p1693_p8 }
 0x199   : > { %v691_v21 = vpop.f32.mrb[0].mxu1 }
 0x19a   : > { %v692_v22 = vadd.f32 %v1345_v17, %v691_v21  ;;  %v1393_v23 = vpop.f32.mrb[1].mxu1 }
 0x19c   : > { %v1382_v24 = vpop.f32.mrb[0].mxu0  ;;  %695 = vst.msk [vmem:[#allocation3] sm:$0xff] %vm527_vm1, %v692_v22 }
 0x19d   : > { %610 = vst.msk [vmem:[#allocation2 + $0x8] sm:$0xff] %vm527_vm1, %v1382_v24  ;;  %v600_v25 = vpop.f32.mrb[1].mxu0 }
 0x19e   : > { %609 = vst.msk [vmem:[#allocation2] sm:$0xff] %vm527_vm1, %v600_v25 }
 0x1a3   : > { %v703_v29 = vld [vmem:[#allocation3] sm:$0xff] }
 0x1a4   : > { %v705_v30 = vcombine.high %v703_v29, %v703_v29  ;;  %v712_v31 = vrot.slane %v703_v29, %v711_v28  ;;  %v2169_v37 = vld [vmem:[#allocation2 + $0x8] sm:$0xff] }
 0x1a5   : > { %v2167_v36 = vld [vmem:[#allocation2] sm:$0xff] }
 0x1a6   : > { %v728_v33 = vrot.slane %v712_v31, %v711_v28  ;;  %v720_v34 = vcombine.high %v712_v31, %v712_v31  ;;  %v719_v35 = vrot.slane %v705_v30, %v711_v28 }
 0x1a8   : > { %v757_v38 = vrot.slane %v728_v33, %v2165_v32  ;;  %v742_v39 = vrot.slane %v720_v34, %v711_v28  ;;  %v750_v40 = vcombine.high %v728_v33, %v728_v33  ;;  %v735_v41 = vrot.slane %v719_v35, %v711_v28 }
 0x1a9   : > { %v721_v48 = vcombine.high %v719_v35, %v719_v35 }
 0x1aa   : > { %v794_v42 = vadd.f32 %v757_v38, %v2167_v36  ;;  %v761_v43 = vrot.slane %v742_v39, %v2165_v32  ;;  %v795_v44 = vadd.f32 %v757_v38, %v2169_v37  ;;  %v765_v45 = vrot.slane %v750_v40, %v2165_v32 }
 0x1ab   : > { %v773_v46 = vrot.slane %v735_v41, %v2165_v32  ;;  %v752_v47 = vcombine.high %v742_v39, %v742_v39  ;;  %v749_v55 = vrot.slane %v721_v48, %v711_v28  ;;  %v751_v60 = vcombine.high %v735_v41, %v735_v41 }
 0x1ac   : > { %1508 = vtanh.f32 %v794_v42  ;;  %v796_v49 = vadd.f32 %v761_v43, %v2167_v36  ;;  %v797_v50 = vadd.f32 %v761_v43, %v2169_v37  ;;  %v798_v51 = vadd.f32 %v765_v45, %v2167_v36 }
 0x1ad   : > { %1510 = vtanh.f32 %v795_v44  ;;  %v799_v52 = vadd.f32 %v765_v45, %v2169_v37  ;;  %v802_v53 = vadd.f32 %v773_v46, %v2167_v36  ;;  %v769_v54 = vrot.slane %v752_v47, %v2165_v32 }
 0x1ae   : > { %1512 = vtanh.f32 %v796_v49  ;;  %v803_v56 = vadd.f32 %v773_v46, %v2169_v37  ;;  %v777_v59 = vrot.slane %v749_v55, %v2165_v32  ;;  %v781_v3 = vrot.slane %v751_v60, %v2165_v32 }
 0x1af   : > { %1514 = vtanh.f32 %v797_v50  ;;  %v800_v58 = vadd.f32 %v769_v54, %v2167_v36  ;;  %v801_v62 = vadd.f32 %v769_v54, %v2169_v37  ;;  %v753_v4 = vcombine.high %v749_v55, %v749_v55 }
 0x1b0   : > { %1516 = vtanh.f32 %v798_v51  ;;  %v804_v2 = vadd.f32 %v777_v59, %v2167_v36  ;;  %v805_v10 = vadd.f32 %v777_v59, %v2169_v37  ;;  %v806_v14 = vadd.f32 %v781_v3, %v2167_v36 }
 0x1b1   : > { %1518 = vtanh.f32 %v799_v52  ;;  %v785_v15 = vrot.slane %v753_v4, %v2165_v32  ;;  %v807_v19 = vadd.f32 %v781_v3, %v2169_v37 }
 0x1b2   : > { %1520 = vtanh.f32 %v802_v53 }
 0x1b3   : > { %1522 = vtanh.f32 %v803_v56  ;;  %v808_v24 = vadd.f32 %v785_v15, %v2167_v36  ;;  %v809_v29 = vadd.f32 %v785_v15, %v2169_v37 }
 0x1b4   : > { %1524 = vtanh.f32 %v800_v58 }
 0x1b5   : > { %1526 = vtanh.f32 %v801_v62 }
 0x1b6   : > { %v1509_v61 = vpop.eup %1508  ;;  %1528 = vtanh.f32 %v804_v2 }
 0x1b7   : > { %v1511_v63 = vpop.eup %1510  ;;  %v832_v0 = vmul.f32 %v1509_v61, %v2187_v57  ;;  %1530 = vtanh.f32 %v805_v10 }
 0x1b8   : > { %v1513_v1 = vpop.eup %1512  ;;  %v833_v8 = vmul.f32 %v1511_v63, %v2187_v57  ;;  %1532 = vtanh.f32 %v806_v14 }
 0x1b9   : > { %v1515_v5 = vpop.eup %1514  ;;  %v848_v6 = vsel %vm527_vm1, %v832_v0, 0.0  ;;  %v834_v7 = vmul.f32 %v1513_v1, %v2187_v57  ;;  %1534 = vtanh.f32 %v807_v19  ;;  %v920_v1 = vand.u32 127, %v709_v20 }
 0x1ba   : > { %v1517_v9 = vpop.eup %1516  ;;  %849 = vadd.xlane.f32.xlu0 %v848_v6  ;;  %v835_v12 = vmul.f32 %v1515_v5, %v2187_v57  ;;  %v851_v16 = vsel %vm527_vm1, %v833_v8, 0.0  ;;  %1536 = vtanh.f32 %v808_v24  ;;  %v1809_v24 = vmov 0  }
 0x1bb   : > { %v854_v11 = vsel %vm527_vm1, %v834_v7, 0.0  ;;  %v1519_v13 = vpop.eup %1518  ;;  %v836_v17 = vmul.f32 %v1517_v9, %v2187_v57  ;;  %1538 = vtanh.f32 %v809_v29  ;;  %v923_v7 = vsub.s32 %v920_v1, %v2160_v27  ;;  %v701_v9 = vld [vmem:[%s516_s25] sm:$0x1] }
 0x1bc   : > { %855 = vadd.xlane.f32.xlu1 %v854_v11  ;;  %v1521_v18 = vpop.eup %1520  ;;  %v857_v21 = vsel %vm527_vm1, %v835_v12, 0.0  ;;  %v837_v22 = vmul.f32 %v1519_v13, %v2187_v57  ;;  %vm896_vm3 = vcmp.ne.s32.totalorder %v701_v9, 0 }
 0x1bd   : > { %v1523_v23 = vpop.eup %1522  ;;  %v860_v25 = vsel %vm527_vm1, %v836_v17, 0.0  ;;  %v840_v26 = vmul.f32 %v1521_v18, %v2187_v57 }
 0x1be   : > { %852 = vadd.xlane.f32.xlu0 %v851_v16  ;;  %v1525_v28 = vpop.eup %1524  ;;  %v863_v30 = vsel %vm527_vm1, %v837_v22, 0.0  ;;  %v841_v31 = vmul.f32 %v1523_v23, %v2187_v57 }
 0x1bf   : > { %v1527_v33 = vpop.eup %1526  ;;  %v872_v34 = vsel %vm527_vm1, %v840_v26, 0.0  ;;  %v838_v35 = vmul.f32 %v1525_v28, %v2187_v57 }
 0x1c0   : > { %858 = vadd.xlane.f32.xlu1 %v857_v21  ;;  %v1529_v36 = vpop.eup %1528  ;;  %v875_v38 = vsel %vm527_vm1, %v841_v31, 0.0  ;;  %v839_v39 = vmul.f32 %v1527_v33, %v2187_v57 }
 0x1c1   : > { %v1531_v40 = vpop.eup %1530  ;;  %v866_v37 = vsel %vm527_vm1, %v838_v35, 0.0  ;;  %v842_v41 = vmul.f32 %v1529_v36, %v2187_v57 }
 0x1c2   : > { %861 = vadd.xlane.f32.xlu0 %v860_v25  ;;  %v1533_v42 = vpop.eup %1532  ;;  %v869_v43 = vsel %vm527_vm1, %v839_v39, 0.0  ;;  %v843_v44 = vmul.f32 %v1531_v40, %v2187_v57  ;;  %v897_v25 = vsel %vm896_vm3, 1, %v1809_v24 }
 0x1c3   : > { %v1535_v45 = vpop.eup %1534  ;;  %v878_v46 = vsel %vm527_vm1, %v842_v41, 0.0  ;;  %v844_v47 = vmul.f32 %v1533_v42, %v2187_v57  ;;  %v901_v39 = vrot.slane %v897_v25, %v2165_v32 }
 0x1c4   : > { %864 = vadd.xlane.f32.xlu1 %v863_v30  ;;  %v1537_v48 = vpop.eup %1536  ;;  %v881_v49 = vsel %vm527_vm1, %v843_v44, 0.0  ;;  %v845_v50 = vmul.f32 %v1535_v45, %v2187_v57 }
 0x1c5   : > { %v1539_v51 = vpop.eup %1538  ;;  %v884_v52 = vsel %vm527_vm1, %v844_v47, 0.0  ;;  %v846_v53 = vmul.f32 %v1537_v48, %v2187_v57  ;;  %vm902_vm11 = vcmp.eq.s32.totalorder %v901_v39, 1 }
 0x1c6   : > { %873 = vadd.xlane.f32.xlu0 %v872_v34  ;;  %v887_v54 = vsel %vm527_vm1, %v845_v50, 0.0  ;;  %v847_v55 = vmul.f32 %v1539_v51, %v2187_v57  ;;  %v925_v57 = vadd.s32 4294967288, %v920_v1 }
 0x1c7   : > { %v890_v56 = vsel %vm527_vm1, %v846_v53, 0.0 }
 0x1c8   : > { %876 = vadd.xlane.f32.xlu1 %v875_v38  ;;  %v893_v58 = vsel %vm527_vm1, %v847_v55, 0.0  ;;  %v928_v5 = vsub.s32 %v925_v57, %v2160_v27 }
 0x1ca   : > { %867 = vadd.xlane.f32.xlu0 %v866_v37 }
 0x1cc   : > { %870 = vadd.xlane.f32.xlu1 %v869_v43 }
 0x1ce   : > { %879 = vadd.xlane.f32.xlu0 %v878_v46 }
 0x1d0   : > { %882 = vadd.xlane.f32.xlu1 %v881_v49 }
 0x1d2   : > { %885 = vadd.xlane.f32.xlu0 %v884_v52 }
 0x1d4   : > { %888 = vadd.xlane.f32.xlu1 %v887_v54  ;;  %v1348_v54 = vld [vmem:[%s519_s27] ss:$0 sm:$0xff] }
 0x1d6   : > { %891 = vadd.xlane.f32.xlu0 %v890_v56 }
 0x1d8   : > { %894 = vadd.xlane.f32.xlu1 %v893_v58 }
 0x247   : > { %v850_v59 = vpop.xlane.xlu0 %849 }
 0x248   : > { %v924_v16 = vrot.slane %v850_v59, %v923_v7  ;;  %v699_v59 = vld [vmem:[%s2139_s9] sm:$0xff] }
 0x249   : > { %v856_v60 = vpop.xlane.xlu1 %855 }
 0x24a   : > { %v935_v11 = vrot.slane %v856_v60, %v923_v7  ;;  %v700_v60 = vld [vmem:[%s2139_s9 + $0x8] sm:$0xff]  ;;  %s1114_s9 = scalar_lea.sflag [#allocation15], %s2120_s15 }
 0x24b   : > { %v853_v61 = vpop.xlane.xlu0 %852 }
 0x24c   : > { %v929_v12 = vrot.slane %v853_v61, %v928_v5  ;;  %v1416_v61 = vpack.c.bf16 %v700_v60, %v699_v59 }
 0x24d   : > { %v859_v62 = vpop.xlane.xlu1 %858 }
 0x24e   : > { %v939_v8 = vrot.slane %v859_v62, %v928_v5  ;;  %v931_v21 = vsel %vm930_vm2, %v929_v12, %v924_v16  ;;  %1417 = vmatpush3.bf16.msra.mxu0 %v1416_v61 }
 0x24f   : > { %v862_v63 = vpop.xlane.xlu0 %861 }
 0x250   : > { %v944_v14 = vrot.slane %v862_v63, %v923_v7  ;;  %v940_v17 = vsel %vm930_vm2, %v939_v8, %v935_v11 }
 0x251   : > { %v865_v0 = vpop.xlane.xlu1 %864  ;;  %v996_v26 = vsel %vm995_vm4, %v940_v17, %v931_v21 }
 0x252   : > { %v948_v10 = vrot.slane %v865_v0, %v928_v5 }
 0x253   : > { %v874_v2 = vpop.xlane.xlu0 %873 }
 0x254   : > { %v949_v19 = vsel %vm930_vm2, %v948_v10, %v944_v14  ;;  %v962_v34 = vrot.slane %v874_v2, %v923_v7 }
 0x255   : > { %v877_v3 = vpop.xlane.xlu1 %876  ;;  %v998_v30 = vsel %vm997_vm5, %v949_v19, %v996_v26 }
 0x256   : > { %v966_v28 = vrot.slane %v877_v3, %v928_v5 }
 0x257   : > { %v868_v4 = vpop.xlane.xlu0 %867 }
 0x258   : > { %v953_v18 = vrot.slane %v868_v4, %v923_v7  ;;  %v967_v37 = vsel %vm930_vm2, %v966_v28, %v962_v34 }
 0x259   : > { %v871_v6 = vpop.xlane.xlu1 %870 }
 0x25a   : > { %v957_v13 = vrot.slane %v871_v6, %v928_v5 }
 0x25b   : > { %v880_v20 = vpop.xlane.xlu0 %879 }
 0x25c   : > { %v958_v22 = vsel %vm930_vm2, %v957_v13, %v953_v18  ;;  %v971_v31 = vrot.slane %v880_v20, %v923_v7 }
 0x25d   : > { %v883_v15 = vpop.xlane.xlu1 %882  ;;  %v1000_v35 = vsel %vm999_vm6, %v958_v22, %v998_v30 }
 0x25e   : > { %v975_v23 = vrot.slane %v883_v15, %v928_v5  ;;  %v1002_v45 = vsel %vm1001_vm7, %v967_v37, %v1000_v35 }
 0x25f   : > { %v886_v27 = vpop.xlane.xlu0 %885 }
 0x260   : > { %v980_v36 = vrot.slane %v886_v27, %v923_v7  ;;  %v976_v40 = vsel %vm930_vm2, %v975_v23, %v971_v31 }
 0x261   : > { %v889_v29 = vpop.xlane.xlu1 %888  ;;  %v1004_v46 = vsel %vm1003_vm8, %v976_v40, %v1002_v45 }
 0x262   : > { %v984_v33 = vrot.slane %v889_v29, %v928_v5 }
 0x263   : > { %v892_v38 = vpop.xlane.xlu0 %891 }
 0x264   : > { %v985_v41 = vsel %vm930_vm2, %v984_v33, %v980_v36  ;;  %v989_v43 = vrot.slane %v892_v38, %v923_v7 }
 0x265   : > { %v895_v42 = vpop.xlane.xlu1 %894  ;;  %v1006_v48 = vsel %vm1005_vm9, %v985_v41, %v1004_v46 }
 0x266   : > { %v993_v44 = vrot.slane %v895_v42, %v928_v5 }
 0x268   : > { %v994_v47 = vsel %vm930_vm2, %v993_v44, %v989_v43 }
 0x269   : > { %v1008_v32 = vsel %vm1007_vm10, %v994_v47, %v1006_v48 }
 0x26a   : > { %v1010_v49 = vsel %vm902_vm11, %v1008_v32, -1e+09 }
 0x26b   : > { %v1012_v50 = vsel %vm1011_vm12, %v1010_v49, -inf }
 0x26c   : > { %1013 = vmax.xlane.f32.xlu0 %v1012_v50 }
 0x2f9   : > { %v1014_v51 = vpop.xlane.xlu0 %1013 }
 0x2fa   : > { %v1015_v52 = vsub.f32 %v1010_v49, %v1014_v51 }
 0x2fc   : > { %v1016_v53 = vmul.f32 1.442695, %v1015_v52 }
 0x2fe   : > { %1540 = vpow2.f32 %v1016_v53 }
 0x308   : > { %v1541_v55 = vpop.eup %1540 }
 0x309   : > { %v1024_v56 = vmul.f32 %v1541_v55, %v1348_v54 }
 0x30b   : > { %v1025_v58 = vsel %vm1011_vm12, %v1024_v56, 0.0 }
 0x30c   : > { %1026 = vadd.xlane.f32.xlu1 %v1025_v58 }
 0x399   : > { %v1027_v62 = vpop.xlane.xlu1 %1026 }
 0x39a   : > { %1542 = vrcp.f32 %v1027_v62 }
 0x3a4   : > { %v1543_v63 = vpop.eup %1542 }
 0x3a5   : > { %v1029_v0 = vmul.f32 %v1543_v63, %v1027_v62 }
 0x3a7   : > { %v1030_v1 = vsub.f32 2.0, %v1029_v0 }
 0x3a9   : > { %v1031_v2 = vmul.f32 %v1543_v63, %v1030_v1 }
 0x3ab   : > { %v1032_v57 = vmul.f32 %v1031_v2, %v1024_v56 }
 0x3ad   : > { %1399 = vmatmul.mubr.msk.f32.vlgmr.msra.gmra.mrb[2].mxu0 %vm1011_vm12, %v1032_v57  ;;  %1107 = vst.msk [vmem:[%s513_s26] sm:$0xff] %vm1011_vm12, %v1032_v57 }
 0x3ae   : > { %1703 = shalt.err (!%p1700_p5)
}
 0x3af   : > { %s1704_s30 = scalar_lea.hbm %s2269_s23, 128  ;;  %s1708_s25 = scalar_lea.hbm %s2350_s10, 256 }
 0x3b0   : > { %p1705_p12 = scmp.ne.s32.totalorder %s2269_s23, %s1704_s30  ;;  %p1709_p11 = scmp.lt.u32.totalorder %s2269_s23, %s2350_s10 }
 0x3b1   : > { %p1710_p1 = scmp.lt.u32.totalorder %s1708_s25, %s1704_s30  ;;  %p1712_p10 = scmp.lt.u32.totalorder %s1704_s30, %s2269_s23 }
 0x3b2   : > { %p1706_p0 = pnand %p1705_p12, %p2405_p4 }
 0x3b3   : > { %p1711_p6 = por %p1710_p1, %p1709_p11 }
 0x3b4   : > { %p1707_p3 = pneg %p1706_p0 }
 0x3b5   : > { %p1713_p9 = por %p1712_p10, %p1711_p6 }
 0x3b7   : > { %p1714_p8 = pnand %p1713_p9, %p1707_p3 }
 0x3b9   : > { %1717 = shalt.err (!%p1714_p8)
}
 0x3ba   : > { %1433 = dma.vmem_to_hbm [thread:$0]  (%p2405_p4), %s1141_s11, 128, %s2269_s23, %s1114_s9  }
 0x3bb   : > { %s506_s27 = scalar_lea.vmem [#allocation13], %s2132_s21  ;;  %s2406_s19 = sld [smem:[#allocation29_spill]] }
 0x3bc   : > { %s1127_s26 = sshll.u32 %s506_s27, 4  ;;  %s1109_s12 = scalar_lea.sflag [#allocation6], %s2120_s15  ;;  %s2297_s26 = int_to_ptr.vmem [resolvable:$true] %s1127_s26 }
 0x3bd   : > { %s1718_s29 = scalar_lea.vmem %s2297_s26, 128  ;;  %s1811_s17 = smov [#allocation13]  }
 0x3be   : > { %p1719_p13 = scmp.ne.s32.totalorder %s2297_s26, %s1718_s29  ;;  %s1722_s21 = sshll.u32 %s1811_s17, 4  ;;  %s1723_s21 = int_to_ptr.vmem [resolvable:$false] %s1722_s21 }
 0x3bf   : > { %p1725_p5 = scmp.lt.s32.totalorder %s2297_s26, %s1723_s21 }
 0x3c0   : > { %p1720_p7 = pnand %p1719_p13, %p2405_p4 }
 0x3c1   : > { %s2295_s13 = scalar_lea.hbm %s2406_s19, %s1352_s1  ;;  %s1724_s1 = scalar_lea.vmem %s1723_s21, 256 }
 0x3c2   : > { %p1721_p2 = pneg %p1720_p7  ;;  %p1726_p12 = scmp.lt.s32.totalorder %s1724_s1, %s1718_s29 }
 0x3c4   : > { %p1727_p0 = por %p1726_p12, %p1725_p5 }
 0x3c6   : > { %p1728_p3 = pnand %p1727_p0, %p1721_p2 }
 0x480   : > { %v1102_v3 = vpop.f32.mrb[2].mxu0 }
 0x481   : > { %1106 = vst.msk [vmem:[%s506_s27] sm:$0xff] %vm527_vm1, %v1102_v3  ;;  %v1400_v4 = vpop.f32.mrb[3].mxu0 }
 0x482   : > { %1731 = shalt.err (!%p1728_p3)
}
 0x483   : > { %s1732_s15 = scalar_lea.hbm %s2295_s13, 128  ;;  %s1736_s9 = scalar_lea.hbm %s2406_s19, 256 }
 0x484   : > { %p1733_p11 = scmp.ne.s32.totalorder %s2295_s13, %s1732_s15  ;;  %p1737_p10 = scmp.lt.u32.totalorder %s2295_s13, %s2406_s19 }
 0x485   : > { %p1738_p9 = scmp.lt.u32.totalorder %s1736_s9, %s1732_s15  ;;  %p1740_p13 = scmp.lt.u32.totalorder %s1732_s15, %s2295_s13 }
 0x486   : > { %p1734_p1 = pnand %p1733_p11, %p2405_p4 }
 0x487   : > { %p1739_p8 = por %p1738_p9, %p1737_p10 }
 0x488   : > { %p1735_p6 = pneg %p1734_p1 }
 0x489   : > { %p1741_p7 = por %p1740_p13, %p1739_p8 }
 0x48b   : > { %p1742_p2 = pnand %p1741_p7, %p1735_p6 }
 0x48d   : > { %1745 = shalt.err (!%p1742_p2)
}
 0x48e   : > { %1432 = dma.vmem_to_hbm [thread:$0]  (%p2405_p4), %s2297_s26, 128, %s2295_s13, %s1109_s12  }
 0x48f PF: > { %s2407_s24 = sld [smem:[#allocation21_spill]]  ;;  %s2408_s25 = sld [smem:[#allocation23_spill]] }
 0x490   : > { %p2410_p12 = scmp.ge.s32.totalorder %s1796_s16, 2 }
 0x495   : > { %s1152_s18 = sand.u32 1, %s2407_s24   ;;  %p2409_p5 = scmp.ne.s32.totalorder %s2408_s25, 0 }
 0x496   : > { %s1153_s6 = scalar_lea.sflag [#allocation6], %s1152_s18 }
 0x497   : > { %p1454_p0 = pnand %p2410_p12, %p2409_p5 }
 0x499   : > { %1775 = dma.done.wait (!%p1454_p0), %s1153_s6, 128  }
 0x49a   : > { %1777 = vsyncadd (!%p1454_p0), %s1153_s6, 4294967168  ;;  %s1162_s27 = scalar_lea.sflag [#allocation15], %s1152_s18 }
 0x49b   : > { %1779 = dma.done.wait (!%p1454_p0), %s1162_s27, 128  }
 0x49c   : > { %1781 = vsyncadd (!%p1454_p0), %s1162_s27, 4294967168  ;;  %s2411_s16 = sld [smem:[#allocation24_spill]]  ;;  %s2412_s22 = sld [smem:[#allocation22_spill]] }
 0x49d   : > { %s2413_s15 = sld [smem:[#allocation25_spill]]  ;;  %s2414_s13 = smov %s1788_s14 }
 0x4a2   : > { %p31_p4 = scmp.ge.s32.totalorder %s2411_s16, 4   ;;  %s2415_s14 = smov %s2412_s22 }
 0x4a4   :  { %33 = sbr.rel (!%p31_p4) target bundleno = 15 (0xf), region = 156 }
 0x4ab   :  { %1167 = vsyncpa [#allocation5], 1 }
 0x4ac   :  { %1169 = vsyncpa [#allocation5 + $0x1], 1 }
 0x4ad   :  { %1170 = vsyncpa [#allocation8], 1 }
 0x4ae   :  { %1172 = vsyncpa [#allocation8 + $0x1], 1 }
 0x4af   :  { %1173 = vsyncpa [#allocation11], 1 }
 0x4b0   :  { %1174 = vsyncpa [#allocation6], 1 }
 0x4b1   :  { %1176 = vsyncpa [#allocation6 + $0x1], 1 }
 0x4b2   :  { %1177 = vsyncpa [#allocation15], 1 }
 0x4b3   :  { %1179 = vsyncpa [#allocation15 + $0x1], 1 }

</bundles_post_ra>
